<compile_context>
chip_gen: v6e
topology: v6e:2x2x1
jax: 0.10.0
libtpu: 0.0.40
codegen_flags: <defaults>
</compile_context>

<pallas_src>
import functools

import jax
import jax.numpy as jnp
from jax.experimental import pallas as pl
from jax.experimental.pallas import tpu as pltpu


# Below this size, kernel-launch + DMA-descriptor overhead dominates the copy:
# prefer a native XLA copy (which XLA can also elide entirely).
_SMALL_COPY_BYTES = 256 * 1024
# Aim for roughly this many bytes per DMA descriptor when chunking.
_CHUNK_TARGET_BYTES = 64 * 1024 * 1024
_MAX_CHUNKS = 8


def _copy_kernel(x_hbm, o_hbm, sem, *, chunks):
    """HBM -> HBM copy. `chunks` is a static tuple of (start, size) along axis 0."""
    if len(chunks) == 1:
        # Single whole-tensor DMA (no slicing, no VMEM staging).
        cp = pltpu.make_async_copy(x_hbm, o_hbm, sem.at[0])
        cp.start()
        cp.wait()
        return
    # Multiple in-flight DMA descriptors: start all, then wait all.
    copies = []
    for i, (start, size) in enumerate(chunks):
        cp = pltpu.make_async_copy(
            x_hbm.at[pl.ds(start, size)],
            o_hbm.at[pl.ds(start, size)],
            sem.at[i],
        )
        cp.start()
        copies.append(cp)
    for cp in copies:
        cp.wait()


def _chunk_plan(x):
    """Static chunk boundaries along the leading axis for the DMA copy."""
    nbytes = int(x.size) * x.dtype.itemsize
    lead = x.shape[0] if x.ndim >= 1 else 1
    n_chunks = 1
    if nbytes >= 2 * _CHUNK_TARGET_BYTES and lead >= 2:
        n_chunks = int(min(_MAX_CHUNKS, lead, max(1, nbytes // _CHUNK_TARGET_BYTES)))
    base, rem = divmod(lead, n_chunks)
    chunks, start = [], 0
    for i in range(n_chunks):
        size = base + (1 if i < rem else 0)
        chunks.append((start, size))
        start += size
    return tuple(chunks)


def _materialize_copy_pallas(x):
    """Physical copy of x via HBM->HBM DMA(s); no VMEM staging, no grid."""
    nbytes = int(x.size) * x.dtype.itemsize
    chunks = _chunk_plan(x)
    kernel = functools.partial(_copy_kernel, chunks=chunks)
    return pl.pallas_call(
        kernel,
        out_shape=jax.ShapeDtypeStruct(x.shape, x.dtype),
        in_specs=[pl.BlockSpec(memory_space=pl.ANY)],
        out_specs=pl.BlockSpec(memory_space=pl.ANY),
        scratch_shapes=[pltpu.SemaphoreType.DMA((len(chunks),))],
        cost_estimate=pl.CostEstimate(
            flops=0, transcendentals=0, bytes_accessed=2 * nbytes
        ),
    )(x)


def decoder_forward(x, decoder_name="no_decoder", materialize=False,
                    use_pallas_copy=None):
    """Pallas/JAX equivalent of Decoder.forward for decoder='no_decoder'.

    Default path is a zero-cost identity (no kernel, no HBM traffic).

    materialize=True: return a distinct buffer.
      use_pallas_copy=None  -> auto: XLA copy for small tensors (XLA can also
                               elide/fuse it inside a jit graph), Pallas
                               HBM->HBM DMA for large standalone copies.
      use_pallas_copy=True  -> force the Pallas DMA copy.
      use_pallas_copy=False -> force the XLA copy.
    """
    if decoder_name != "no_decoder":
        # TODO(synk): 'seg2count_decoder' requires the external hldecoder module.
        raise NotImplementedError(
            "Only the 'no_decoder' (identity) path is implemented."
        )
    if not materialize:
        return x

    if use_pallas_copy is None:
        nbytes = int(x.size) * x.dtype.itemsize
        use_pallas_copy = nbytes >= _SMALL_COPY_BYTES
    if not use_pallas_copy:
        # Plain HLO copy: XLA can elide it, fuse it, or turn it into donation.
        return jnp.copy(x)
    return _materialize_copy_pallas(x)


if __name__ == "__main__":
    key = jax.random.PRNGKey(0)
    # Small NCHW input consistent with the module's conv-style usage.
    x = jax.random.normal(key, (2, 4, 16, 16), dtype=jnp.float32)

    # 1) Default (recommended) path: pure identity, no kernel, no copy.
    y = decoder_forward(x, decoder_name="no_decoder")
    y = jax.block_until_ready(y)
    assert y.shape == x.shape and y.dtype == x.dtype
    assert bool(jnp.array_equal(y, x))

    # 2) materialize=True with auto dispatch: tiny tensor -> XLA copy (no
    #    Pallas custom-call, no launch overhead).
    y_xla = decoder_forward(x, decoder_name="no_decoder", materialize=True)
    y_xla = jax.block_until_ready(y_xla)
    assert y_xla.shape == x.shape and y_xla.dtype == x.dtype
    assert bool(jnp.array_equal(y_xla, x))

    # 3) Explicitly exercise the Pallas HBM->HBM DMA copy kernel once.
    y_dma = decoder_forward(
        x, decoder_name="no_decoder", materialize=True, use_pallas_copy=True
    )
    y_dma = jax.block_until_ready(y_dma)
    assert y_dma.shape == x.shape and y_dma.dtype == x.dtype
    assert bool(jnp.array_equal(y_dma, x))

    print("KERNEL_OK")
</pallas_src>

<mosaic_0001>
module attributes {stable_mosaic.version = 11 : i64} {
  func.func @_copy_kernel(%arg0: memref<2x4x16x16xf32, #tpu.memory_space<any>>, %arg1: memref<2x4x16x16xf32, #tpu.memory_space<any>>, %arg2: memref<1x!tpu.dma_semaphore, #tpu.memory_space<semaphore_mem>>) attributes {dimension_semantics = [], scalar_prefetch = 0 : i64, scratch_operands = 1 : i64, tpu.core_type = #tpu.core_type<tc>} {
    %c0_i32 = arith.constant 0 : i32
    %0 = tpu.memref_slice %arg2[%c0_i32] : memref<1x!tpu.dma_semaphore, #tpu.memory_space<semaphore_mem>> -> memref<1x!tpu.dma_semaphore, #tpu.memory_space<semaphore_mem>>
    %1 = tpu.memref_squeeze %0 : memref<1x!tpu.dma_semaphore, #tpu.memory_space<semaphore_mem>> -> memref<!tpu.dma_semaphore, #tpu.memory_space<semaphore_mem>>
    tpu.enqueue_dma source(%arg0 : memref<2x4x16x16xf32, #tpu.memory_space<any>>) target(%arg1 : memref<2x4x16x16xf32, #tpu.memory_space<any>>) target_semaphore(%1 : memref<!tpu.dma_semaphore, #tpu.memory_space<semaphore_mem>>)
    %c0_i32_0 = arith.constant 0 : i32
    %2 = tpu.memref_slice %arg2[%c0_i32_0] : memref<1x!tpu.dma_semaphore, #tpu.memory_space<semaphore_mem>> -> memref<1x!tpu.dma_semaphore, #tpu.memory_space<semaphore_mem>>
    %3 = tpu.memref_squeeze %2 : memref<1x!tpu.dma_semaphore, #tpu.memory_space<semaphore_mem>> -> memref<!tpu.dma_semaphore, #tpu.memory_space<semaphore_mem>>
    tpu.wait_dma2 semaphore(%3 : memref<!tpu.dma_semaphore, #tpu.memory_space<semaphore_mem>>) src(%arg0 : memref<2x4x16x16xf32, #tpu.memory_space<any>>) dst(%arg1 : memref<2x4x16x16xf32, #tpu.memory_space<any>>)
    return
  }
}

</mosaic_0001>

<bundles_post_ra>
// kernel: tpu_custom_call.1
= control target key start
LH: loop header
LB: loop body
LE: loop exit
PB: predicated region body
PF: predicated region fallthrough
CT: control target
= control target key end

     0   :  { %s30_s6 = smov [#allocation2]   ;;  %s31_s7 = smov 131072   ;;  %s49_s0 = inlined_call_operand.hbm [shape: f32[2,4,16,16], index: 0, kind: input, shape index: {}]   ;;  %s50_s1 = inlined_call_operand.hbm [shape: f32[2,4,16,16], index: 1, kind: output, shape index: {}]  }
   0x1   :  { %s32_s8 = smov 0  }
   0x2   :  { %12 = dma.general %s49_s0, 2048, %s50_s1, %s30_s6, %s31_s7, [#allocation4], %s32_s8, 0  }
   0x3   :  { %28 = dma.done.wait [#allocation2], 2048 }
   0x4   :  { %29 = vsyncadd [#allocation2], 4294965248 }
   0x5   :  { %18 = vsyncmov [#allocation2] }
   0x8   :  { %s19_s13 = vpop.sfrf %18 }
   0x9   :  { %p24_p0 = scmp.ne.s32.totalorder %s19_s13, 0 }
   0xb   :  { %23 = shalt.err (%p24_p0)  }

</bundles_post_ra>
